<compile_context>
chip_gen: v6e
topology: v6e:2x2x1
jax: 0.10.0
libtpu: 0.0.40
codegen_flags: <defaults>
</compile_context>

<pallas_src>
import functools

import jax
import jax.numpy as jnp
from jax.experimental import pallas as pl
from jax.experimental.pallas import tpu as pltpu


def _round_up(x, m):
    return (x + m - 1) // m * m


def _cdiv(a, b):
    return -(-a // b)


# ---------------------------------------------------------------------------
# Kernel: one (tm x Kp) @ (Kp x Dp) MXU matmul per grid step, f32 accumulate,
# fused position-embedding (+ class token at row 0) add, f32 store.
# ---------------------------------------------------------------------------
def _patch_embed_kernel(x_ref, w_ref, b_ref, o_ref):
    # x_ref : (1, TM, Kp)  bf16 -- im2col'd pixels; row 0 of every image is all
    #                              zeros (class-token slot).
    # w_ref : (Kp, Dp)     bf16 -- packed conv weight, VMEM resident.
    # b_ref : (TM, Dp)     f32  -- pos embeddings (+class embedding at row 0).
    # o_ref : (1, TM, Dp)  f32
    acc = jnp.dot(x_ref[0], w_ref[...], preferred_element_type=jnp.float32)
    o_ref[0] = (acc + b_ref[...]).astype(o_ref.dtype)


# ---------------------------------------------------------------------------
# One-time parameter packing (run at init, NOT per forward call).
# ---------------------------------------------------------------------------
def pack_clip_vision_params(conv_weight, class_embedding, pos_embedding,
                            *, compute_dtype=jnp.bfloat16):
    """conv_weight (D,3,P,P) f32, class_embedding (D,) f32,
    pos_embedding (num_patches+1, D) f32
    -> (w_packed (Kp, Dp) bf16, bias (seq, Dp) f32)."""
    D, C, P, _ = conv_weight.shape
    K = C * P * P
    Kp = _round_up(K, 128)          # lane-aligned MXU contracting dim
    Dp = _round_up(D, 128)          # lane-dense output dim

    w = conv_weight.reshape(D, K).T.astype(compute_dtype)       # (K, D)
    w = jnp.pad(w, ((0, Kp - K), (0, Dp - D)))                  # (Kp, Dp)

    bias = pos_embedding.astype(jnp.float32)
    bias = bias.at[0].add(class_embedding.astype(jnp.float32))  # (seq, D)
    bias = jnp.pad(bias, ((0, 0), (0, Dp - D)))                 # (seq, Dp)
    return w, bias


def _vmem_bytes(tm, Kp, Dp):
    # double-buffered x (bf16) + out (f32) + bias (f32) blocks, plus the
    # double-buffered (constant-index, never re-DMA'd) weight.
    return (2 * tm * Kp * 2        # x blocks
            + 2 * tm * Dp * 4      # out blocks
            + 2 * tm * Dp * 4      # bias blocks
            + 2 * Kp * Dp * 2)     # weight


def _choose_row_tile(seq, batch, Kp, Dp, vmem_budget_bytes=12 * 1024 * 1024):
    tm = seq                                   # single tile: fewest grid steps
    if batch == 1 and seq > 128:
        # batch axis cannot feed a 2nd TensorCore (v7x): split rows, 128-aligned.
        tm = min(seq, _round_up(_cdiv(seq, 2), 128))
    while _vmem_bytes(tm, Kp, Dp) > vmem_budget_bytes and tm > 128:
        tm = max(128, _round_up(_cdiv(tm, 2), 128))
    return tm


# ---------------------------------------------------------------------------
# Forward pass.
# ---------------------------------------------------------------------------
def clip_vision_embeddings(pixel_values, w_packed, bias, *, patch_size,
                           hidden_size, row_block=None,
                           compute_dtype=jnp.bfloat16):
    """
    pixel_values : (B, 3, H, W) f32, NCHW
    w_packed     : (Kp, Dp) bf16   (from pack_clip_vision_params)
    bias         : (seq, Dp) f32   (pos + class@row0, from pack_clip_vision_params)
    returns      : (B, num_patches + 1, hidden_size) f32
    """
    B, C, H, W = pixel_values.shape
    P = patch_size
    D = hidden_size
    Kp, Dp = w_packed.shape
    seq = bias.shape[0]
    if H % P != 0 or W % P != 0:
        raise ValueError(f"image size ({H},{W}) not divisible by patch_size {P}")
    Hp, Wp = H // P, W // P
    num_patches = Hp * Wp
    if seq != num_patches + 1:
        raise ValueError("position embedding / image size mismatch")
    K = C * P * P

    # ---- im2col + class-token zero row (fused XLA producer / input fusion) --
    x = pixel_values.astype(compute_dtype)
    x = x.reshape(B, C, Hp, P, Wp, P)
    x = jnp.transpose(x, (0, 2, 4, 1, 3, 5))           # (B, Hp, Wp, C, P, P)
    x = x.reshape(B, num_patches, K)
    # One pad op: leading all-zero row per image (class-token slot) and the
    # K -> Kp zero padding of the contracting dim (numerically exact).
    x = jnp.pad(x, ((0, 0), (1, 0), (0, Kp - K)))       # (B, seq, Kp)

    tm = row_block if row_block is not None else _choose_row_tile(seq, B, Kp, Dp)
    n_row_tiles = _cdiv(seq, tm)

    vmem_limit = None
    est = _vmem_bytes(tm, Kp, Dp)
    if est > 12 * 1024 * 1024:      # above the v5e 16 MiB scoped default margin
        vmem_limit = min(int(est * 3 // 2), 60 * 1024 * 1024)

    out = pl.pallas_call(
        _patch_embed_kernel,
        out_shape=jax.ShapeDtypeStruct((B, seq, Dp), jnp.float32),
        grid_spec=pltpu.PrefetchScalarGridSpec(
            num_scalar_prefetch=0,
            grid=(n_row_tiles, B),                       # batch is the fast axis
            in_specs=[
                pl.BlockSpec((1, tm, Kp), lambda j, b: (b, j, 0)),
                pl.BlockSpec((Kp, Dp), lambda j, b: (0, 0)),   # VMEM resident
                pl.BlockSpec((tm, Dp), lambda j, b: (j, 0)),   # resident per j
            ],
            out_specs=pl.BlockSpec((1, tm, Dp), lambda j, b: (b, j, 0)),
        ),
        compiler_params=pltpu.CompilerParams(
            dimension_semantics=("parallel", "parallel"),
            allow_input_fusion=[True, False, False],
            vmem_limit_bytes=vmem_limit,
        ),
    )(x, w_packed, bias)

    if Dp != D:
        out = out[:, :, :D]
    return out


# ---------------------------------------------------------------------------
# Pure-JAX f32 reference of the PyTorch forward.
# ---------------------------------------------------------------------------
def _reference(pixel_values, conv_weight, class_embedding, pos_embedding, patch_size):
    B = pixel_values.shape[0]
    D = conv_weight.shape[0]
    P = patch_size
    conv_out = jax.lax.conv_general_dilated(
        pixel_values, conv_weight, window_strides=(P, P), padding="VALID",
        dimension_numbers=("NCHW", "OIHW", "NCHW"),
        precision=jax.lax.Precision.HIGHEST)
    patch_embeds = conv_out.reshape(B, D, -1).transpose(0, 2, 1)
    class_embeds = jnp.broadcast_to(class_embedding.reshape(1, 1, D), (B, 1, D))
    emb = jnp.concatenate([class_embeds, patch_embeds], axis=1)
    return emb + pos_embedding[None, :, :]


if __name__ == "__main__":
    # small config: image_size=16, patch_size=4, hidden_size=32, batch=2
    B, C, H, W = 2, 3, 16, 16
    P = 4
    D = 32
    num_patches = (H // P) * (W // P)
    seq = num_patches + 1

    key = jax.random.PRNGKey(0)
    k1, k2, k3, k4 = jax.random.split(key, 4)
    pixel_values = jax.random.normal(k1, (B, C, H, W), dtype=jnp.float32)
    conv_weight = jax.random.normal(k2, (D, C, P, P), dtype=jnp.float32) * 0.02
    class_embedding = jax.random.normal(k3, (D,), dtype=jnp.float32)
    pos_embedding = jax.random.normal(k4, (seq, D), dtype=jnp.float32) * 0.02

    # One-time packing (init-time, outside the per-call path).
    w_packed, bias = pack_clip_vision_params(conv_weight, class_embedding,
                                             pos_embedding)

    fwd = jax.jit(functools.partial(clip_vision_embeddings,
                                    patch_size=P, hidden_size=D))
    out = jax.block_until_ready(fwd(pixel_values, w_packed, bias))

    ref = _reference(pixel_values, conv_weight, class_embedding, pos_embedding, P)
    assert out.shape == (B, seq, D), out.shape
    max_err = float(jnp.max(jnp.abs(out - ref)))
    # bf16 MXU inputs with f32 accumulation: error << 2e-2 at these scales.
    assert max_err < 2e-2, max_err

    print("KERNEL_OK")
</pallas_src>

<mosaic_0001>
module attributes {stable_mosaic.version = 11 : i64} {
  func.func @_patch_embed_kernel(%arg0: i32, %arg1: i32, %arg2: memref<1x17x128xbf16, #tpu.memory_space<vmem>>, %arg3: memref<128x128xbf16, #tpu.memory_space<vmem>>, %arg4: memref<17x128xf32, #tpu.memory_space<vmem>>, %arg5: memref<1x17x128xf32, #tpu.memory_space<vmem>>) attributes {dimension_semantics = [#tpu.dimension_semantics<parallel>, #tpu.dimension_semantics<parallel>], iteration_bounds = array<i64: 1, 2>, scalar_prefetch = 0 : i64, scratch_operands = 0 : i64, tpu.core_type = #tpu.core_type<tc>, window_params = [{transform_indices = @transform_0, window_bounds = array<i64: 1, 17, 128>}, {pipeline_mode = #tpu.pipeline_mode<synchronous>, transform_indices = @transform_1, window_bounds = array<i64: 128, 128>}, {transform_indices = @transform_2, window_bounds = array<i64: 17, 128>}, {transform_indices = @transform_3, window_bounds = array<i64: 1, 17, 128>}]} {
    %c0 = arith.constant 0 : index
    %c0_0 = arith.constant 0 : index
    %c0_1 = arith.constant 0 : index
    %0 = vector.load %arg2[%c0, %c0_0, %c0_1] : memref<1x17x128xbf16, #tpu.memory_space<vmem>>, vector<1x17x128xbf16>
    %1 = vector.shape_cast %0 : vector<1x17x128xbf16> to vector<17x128xbf16>
    %c0_2 = arith.constant 0 : index
    %c0_3 = arith.constant 0 : index
    %2 = vector.load %arg3[%c0_2, %c0_3] : memref<128x128xbf16, #tpu.memory_space<vmem>>, vector<128x128xbf16>
    %cst = arith.constant dense<0.000000e+00> : vector<17x128xf32>
    %3 = tpu.matmul %1, %2, %cst {dimension_numbers = #tpu.dot_dimension_numbers<[1], [0], [0], [1], [0, 0, 1, 1], [], []>} : vector<17x128xbf16>, vector<128x128xbf16>, vector<17x128xf32> -> vector<17x128xf32>
    %c0_4 = arith.constant 0 : index
    %c0_5 = arith.constant 0 : index
    %4 = vector.load %arg4[%c0_4, %c0_5] : memref<17x128xf32, #tpu.memory_space<vmem>>, vector<17x128xf32>
    %5 = arith.addf %3, %4 : vector<17x128xf32>
    %c0_6 = arith.constant 0 : index
    %c0_7 = arith.constant 0 : index
    %c0_8 = arith.constant 0 : index
    %6 = vector.load %arg5[%c0_6, %c0_7, %c0_8] : memref<1x17x128xf32, #tpu.memory_space<vmem>>, vector<1x17x128xf32>
    %7 = vector.shape_cast %6 : vector<1x17x128xf32> to vector<17x128xf32>
    %8 = vector.shape_cast %5 : vector<17x128xf32> to vector<1x17x128xf32>
    tpu.vector_store %arg5[%c0_6, %c0_7, %c0_8], %8 {strides = array<i32>} : memref<1x17x128xf32, #tpu.memory_space<vmem>>, vector<1x17x128xf32>,
    return
  }
  func.func @transform_0(%arg0: i32, %arg1: i32) -> (i32, i32, i32) {
    %c0_i32 = arith.constant 0 : i32
    %c0_i32_0 = arith.constant 0 : i32
    return %arg1, %arg0, %c0_i32 : i32, i32, i32
  }
  func.func @transform_1(%arg0: i32, %arg1: i32) -> (i32, i32) {
    %c0_i32 = arith.constant 0 : i32
    %c0_i32_0 = arith.constant 0 : i32
    %c0_i32_1 = arith.constant 0 : i32
    return %c0_i32, %c0_i32_0 : i32, i32
  }
  func.func @transform_2(%arg0: i32, %arg1: i32) -> (i32, i32) {
    %c0_i32 = arith.constant 0 : i32
    %c0_i32_0 = arith.constant 0 : i32
    return %arg0, %c0_i32 : i32, i32
  }
  func.func @transform_3(%arg0: i32, %arg1: i32) -> (i32, i32, i32) {
    %c0_i32 = arith.constant 0 : i32
    %c0_i32_0 = arith.constant 0 : i32
    return %arg1, %arg0, %c0_i32 : i32, i32, i32
  }
}

</mosaic_0001>

<bundles_post_ra>
// kernel: clip_vision_embeddings.2
= control target key start
LH: loop header
LB: loop body
LE: loop exit
PB: predicated region body
PF: predicated region fallthrough
CT: control target
= control target key end

     0   :  { %s717_s17 = smov 0   ;;  %s719_s18 = smov 0   ;;  %s791_s0 = inlined_call_operand.vmem [shape: bf16[128,128], index: 0, kind: input, shape index: {}]   ;;  %s792_s1 = inlined_call_operand.vmem [shape: f32[17,128], index: 1, kind: input, shape index: {}]   ;;  %s793_s2 = inlined_call_operand.vmem [shape: bf16[2,16,48], index: 2, kind: input, shape index: {}]   ;;  %s794_s3 = inlined_call_operand.<no memory space> [shape: bf16[], index: 3, kind: input, shape index: {}]   ;;  %s795_s4 = inlined_call_operand.vmem [shape: f32[2,17,128], index: 4, kind: output, shape index: {}]  }
   0x1   :  { %v9_v0 = vstv %s794_s3  ;;  %s721_s19 = smov 0  }
   0x2   :  { %v715_v1 = vunpack.i.l.bf16 %v9_v0 }
   0x3 LB: > { %s28_s3 = sadd.s32 1, %s680_s18  ;;  %p578_p0 = scmp.ge.s32.totalorder %s684_s19, 1  ;;  %s684_s19 = sphi %s721_s19, %s19_s19   ;;  %s680_s18 = sphi %s719_s18, %s797_s18   ;;  %s676_s17 = sphi %s717_s17, %s796_s17  }
   0x4   : > { %p29_p1 = scmp.ge.s32.totalorder %s28_s3, 2  ;;  %p182_p2 = scmp.lt.s32.totalorder %s684_s19, 3 }
   0x6   : > { %s799_s3 = smov (%p29_p1, %s28_s3), 0  ;;  %p183_p3 = pnand %p578_p0, %p182_p2 }
   0x8   : > { %186 = sbr.rel (%p183_p3) target bundleno = 248 (0xf8), region = 32 }
   0xd   : > { %v652_v2 = vld [vmem:[%s791_s0 + $0x38] sm:$0xff]   ;;  %p227_p4 = scmp.lt.s32.totalorder %s676_s17, 1  ;;  %v293_v3 = vlaneseq  ;;  %v653_v4 = vld [vmem:[%s791_s0 + $0x30] sm:$0xff]   ;;  %v654_v5 = vld [vmem:[%s791_s0 + $0x28] sm:$0xff]   ;;  %vm298_vm1 = vcmask 1046528   ;;  %v686_v20 = vmov 0.0  }
   0xe   : > { %606 = vmatprep.subr.bf16.mxu0 %v652_v2  ;;  %v655_v7 = vld [vmem:[%s791_s0 + $0x20] sm:$0xff]   ;;  %v656_v13 = vld [vmem:[%s791_s0 + $0x18] sm:$0xff]   ;;  %v657_v24 = vld [vmem:[%s791_s0 + $0x10] sm:$0xff]  }
   0xf   : > { %s801_s17 = smov (!%p227_p4, %s676_s17), 1  ;;  %607 = vmatpush3.bf16.msra.mxu0 %v652_v2  ;;  %v294_v6 = vand.u32 127, %v293_v3  ;;  %v658_v25 = vld [vmem:[%s791_s0 + $0x8] sm:$0xff]   ;;  %v659_v26 = vld [vmem:[%s791_s0] sm:$0xff]   ;;  %v361_v29 = vld [vmem:[%s792_s1 + $0x10] sm:$0x1] }
  0x10   : > { %608 = vmatprep.subr.bf16.mxu0 %v653_v4  ;;  %s579_s26 = sshll.u32 %s801_s17, 1  ;;  %s626_s16 = smul.u32 24, %s801_s17  ;;  %v359_v31 = vld [vmem:[%s792_s1] sm:$0xff]  ;;  %v360_v36 = vld [vmem:[%s792_s1 + $0x8] sm:$0xff] }
  0x11   : > { %s233_s27 = sadd.s32 4294967295, %s579_s26  ;;  %vm296_vm0 = vcmp.lt.s32.totalorder %v294_v6, 48 }
  0x12   : > { %s580_s28 = sshll.u32 %s233_s27, 2  ;;  %s254_s24 = scalar_lea.vmem %s795_s4, %s626_s16 }
  0x13   : > { %609 = vmatpush3.bf16.msra.mxu0 %v653_v4  ;;  %s235_s5 = scalar_lea.vmem %s793_s2, %s580_s28 }
  0x14   : > { %610 = vmatprep.subr.bf16.mxu0 %v654_v5  ;;  %v582_v8 = vld [vmem:[%s235_s5 + $0x4] sm:$0xff]  }
  0x15   : > { %v291_v9 = vunpack.c.l.bf16 %v582_v8  ;;  %v316_v10 = vunpack.c.h.bf16 %v582_v8 }
  0x17   : > { %611 = vmatpush3.bf16.msra.mxu0 %v654_v5  ;;  %v297_v11 = vsel %vm296_vm0, %v291_v9, %v715_v1  ;;  %v322_v12 = vsel %vm296_vm0, %v316_v10, %v715_v1 }
  0x18   : > { %612 = vmatprep.subr.bf16.mxu0 %v655_v7  ;;  %v299_v14 = vsel %vm298_vm1, %v297_v11, %v715_v1  ;;  %v324_v15 = vsel %vm298_vm1, %v322_v12, %v297_v11  ;;  %v332_v16 = vsel %vm298_vm1, %v715_v1, %v322_v12 }
  0x19   : > { %v300_v17 = vrot.slane %v299_v14, 7  ;;  %v325_v18 = vrot.slane %v324_v15, 7  ;;  %v333_v19 = vrot.slane %v332_v16, 7 }
  0x1b   : > { %613 = vmatpush3.bf16.msra.mxu0 %v655_v7  ;;  %v301_v21 = vpack.c.bf16 %v686_v20, %v300_v17  ;;  %v327_v22 = vpack.c.bf16 %v686_v20, %v325_v18  ;;  %v335_v23 = vpack.c.bf16 %v686_v20, %v333_v19 }
  0x1c   : > { %614 = vmatprep.subr.bf16.mxu0 %v656_v13 }
  0x1d   : > { %304 = vst [vmem:[#allocation7] sm:$0xf] %v301_v21  ;;  %330 = vst [vmem:[#allocation7 + $0x4] sm:$0xf] %v327_v22 }
  0x1e   : > { %338 = vst [vmem:[#allocation7 + $0x8] sm:$0xf] %v335_v23 }
  0x1f   : > { %615 = vmatpush3.bf16.msra.mxu0 %v656_v13 }
  0x20   : > { %616 = vmatprep.subr.bf16.mxu0 %v657_v24 }
  0x23   : > { %617 = vmatpush3.bf16.msra.mxu0 %v657_v24 }
  0x24   : > { %618 = vmatprep.subr.bf16.mxu0 %v658_v25  ;;  %v660_v27 = vld [vmem:[#allocation7] sm:$0xff]  }
  0x25   : > { %622 = vmatprep.mubr.bf16.mxu0 %v660_v27  ;;  %v661_v28 = vld [vmem:[#allocation7 + $0x8] ss:$0 sps:$4 sm:$0x11]  }
  0x27   : > { %619 = vmatpush3.bf16.msra.mxu0 %v658_v25 }
  0x28   : > { %620 = vmatprep.subr.bf16.mxu0 %v659_v26 }
  0x2b   : > { %621 = vmatpush3.bf16.msra.mxu0 %v659_v26 }
  0x2e   : > { %623 = vmatmul.mubr.bf16.vlgmr.msra.gmra.mxu0 %v661_v28 }
  0xee   : > { %v624_v30 = vpop.f32.mrf.mxu0 }
  0xef   : > { %v463_v32 = vadd.f32 %v624_v30, %v361_v29 }
  0xf0   : > { %v454_v33 = vpop.f32.mrf.mxu0 }
  0xf1   : > { %470 = vst [vmem:[%s254_s24 + $0x10] sm:$0x1] %v463_v32  ;;  %v455_v34 = vadd.f32 %v454_v33, %v359_v31 }
  0xf2   : > { %v625_v35 = vpop.f32.mrf.mxu0 }
  0xf3   : > { %468 = vst [vmem:[%s254_s24] sm:$0xff] %v455_v34 }
  0xf4   : > { %v457_v37 = vpop.f32.mrf.mxu0 }
  0xf5   : > { %v458_v38 = vadd.f32 %v457_v37, %v360_v36 }
  0xf7   : > { %469 = vst [vmem:[%s254_s24 + $0x8] sm:$0xff] %v458_v38 }
  0xf8 PF: > { %s19_s19 = sadd.s32 1, %s684_s19   ;;  %s796_s17 = smov %s680_s18 }
  0xf9   : > { %p16_p5 = scmp.ge.s32.totalorder %s19_s19, 4   ;;  %s797_s18 = smov %s799_s3 }
  0xfb   :  { %18 = sbr.rel (!%p16_p5) target bundleno = 3 (0x3), region = 69 }

</bundles_post_ra>
